<compile_context>
chip_gen: v5e
topology: v5e:2x2
jax: 0.10.0
libtpu: 0.0.40
codegen_flags: <defaults>
</compile_context>

<pallas_src>
import functools
from math import gcd

import jax
import jax.numpy as jnp
from jax.experimental import pallas as pl
from jax.experimental.pallas import tpu as pltpu


# ----------------------------------------------------------------------------
# Kernel: fused Conv1d('same', stride=1, no bias) + GroupNorm + ReLU
# ----------------------------------------------------------------------------
def _conv1d_gn_relu_kernel(x_ref, w_ref, gamma_ref, beta_ref,
                           p_ref, pt_ref, m_ref, mt_ref, out_ref,
                           *, L, Lp, K, inv_count, eps, act, compute_dtype):
    """Refs:
      x_ref   : (TM, Cin)  f32      TM = TB*Lp rows (TB whole samples, Lp>=L, 8-aligned)
      w_ref   : (K, Cin, Cout)      compute_dtype, tap-major conv weights
      gamma/beta : (1, Cout) f32    GroupNorm affine
      p_ref   : (TB, TM) f32        P[b,i] = 1 iff row i is a *real* row of sample b
      pt_ref  : (TM, TB) f32        P^T (passed in; avoids in-kernel transpose)
      m_ref   : (Cout, G) f32       M[c,g] = 1 iff channel c is in group g
      mt_ref  : (G, Cout) f32       M^T
      out_ref : (TM, Cout) f32
    """
    x = x_ref[...]                                           # (TM, Cin) f32
    tm, cin = x.shape
    cout = out_ref.shape[1]
    pad = (K - 1) // 2

    # Position of each row inside its (padded) sample.
    pos = jax.lax.broadcasted_iota(jnp.int32, (tm, 1), 0) % Lp

    # ---- convolution: one MXU matmul per tap on time-shifted rows -----------
    acc = jnp.zeros((tm, cout), jnp.float32)
    for t in range(K):
        d = t - pad                                          # temporal offset
        if d < 0:
            sh = jnp.concatenate(
                [jnp.zeros((-d, cin), jnp.float32), x[:d, :]], axis=0)
            sh = jnp.where(pos < -d, 0.0, sh)                # conv zero padding
        elif d > 0:
            sh = jnp.concatenate(
                [x[d:, :], jnp.zeros((d, cin), jnp.float32)], axis=0)
            sh = jnp.where(pos >= L - d, 0.0, sh)            # conv zero padding
        else:
            sh = x
        acc = acc + jnp.dot(sh.astype(compute_dtype), w_ref[t],
                            preferred_element_type=jnp.float32)

    # ---- GroupNorm: stats per (sample, group) over all L positions ----------
    P = p_ref[...]
    PT = pt_ref[...]
    M = m_ref[...]
    MT = mt_ref[...]

    mean_g = jnp.dot(jnp.dot(P, acc, preferred_element_type=jnp.float32), M,
                     preferred_element_type=jnp.float32) * inv_count    # (TB, G)
    mean_c = jnp.dot(PT, jnp.dot(mean_g, MT, preferred_element_type=jnp.float32),
                     preferred_element_type=jnp.float32)                # (TM, Cout)
    cen = acc - mean_c
    var_g = jnp.dot(jnp.dot(P, cen * cen, preferred_element_type=jnp.float32), M,
                    preferred_element_type=jnp.float32) * inv_count     # (TB, G)
    rstd_g = jax.lax.rsqrt(var_g + eps)
    rstd_c = jnp.dot(PT, jnp.dot(rstd_g, MT, preferred_element_type=jnp.float32),
                     preferred_element_type=jnp.float32)                # (TM, Cout)

    y = cen * rstd_c * gamma_ref[...] + beta_ref[...]
    if act:
        y = jnp.maximum(y, 0.0)
    out_ref[...] = y


# ----------------------------------------------------------------------------
# Wrapper
# ----------------------------------------------------------------------------
def conv1d_gn_relu(x, weight, gamma, beta, *, ng=32, eps=1e-5, act=True,
                   compute_dtype=jnp.bfloat16, target_rows=256):
    """Forward pass of LaneGCN Conv1d (norm='GN', kernel_size=3, stride=1).

    x      : (B, C_in, L)     float32 (PyTorch NCL layout)
    weight : (C_out, C_in, K) float32 (nn.Conv1d weight, bias=False)
    gamma, beta : (C_out,)    GroupNorm affine parameters
    Returns: (B, C_out, L) float32.
    """
    B, Cin, L = x.shape
    Cout, Cin2, K = weight.shape
    assert Cin2 == Cin
    assert K % 2 == 1, "only 'same' padding with odd kernel_size is supported"
    # TODO(synk): stride > 1 and norm='BN'/'SyncBN' branches are not implemented
    #             (module defaults: stride=1, norm='GN').
    G = gcd(ng, Cout)
    cg = Cout // G

    # --- tiling: TB whole samples per grid step; rows padded so TM % 8 == 0 --
    Lp = -(-L // 8) * 8
    TB = max(1, min(target_rows // Lp, (B + 1) // 2))   # keep >=2 grid steps if possible
    Bp = -(-B // TB) * TB
    TM = TB * Lp
    grid = Bp // TB

    # --- host-side layout plumbing (channels -> lanes, samples -> row blocks)
    xt = jnp.transpose(x, (0, 2, 1)).astype(jnp.float32)        # (B, L, Cin)
    xt = jnp.pad(xt, ((0, Bp - B), (0, Lp - L), (0, 0)))
    x2d = xt.reshape(Bp * Lp, Cin)
    w_taps = jnp.transpose(weight, (2, 1, 0)).astype(compute_dtype)   # (K,Cin,Cout)
    gamma2 = gamma.reshape(1, Cout).astype(jnp.float32)
    beta2 = beta.reshape(1, Cout).astype(jnp.float32)

    rows = jnp.arange(TM)
    P = ((rows[None, :] // Lp == jnp.arange(TB)[:, None])
         & ((rows[None, :] % Lp) < L)).astype(jnp.float32)      # (TB, TM)
    PT = P.T
    ch = jnp.arange(Cout)
    M = (ch[:, None] // cg == jnp.arange(G)[None, :]).astype(jnp.float32)  # (Cout,G)
    MT = M.T

    kernel = functools.partial(
        _conv1d_gn_relu_kernel, L=L, Lp=Lp, K=K,
        inv_count=1.0 / float(L * cg), eps=float(eps), act=act,
        compute_dtype=compute_dtype)

    def _const(a):
        nd = a.ndim
        return pl.BlockSpec(a.shape, lambda i, _n=nd: (0,) * _n)

    out2d = pl.pallas_call(
        kernel,
        out_shape=jax.ShapeDtypeStruct((Bp * Lp, Cout), jnp.float32),
        grid=(grid,),
        in_specs=[pl.BlockSpec((TM, Cin), lambda i: (i, 0)),
                  _const(w_taps), _const(gamma2), _const(beta2),
                  _const(P), _const(PT), _const(M), _const(MT)],
        out_specs=pl.BlockSpec((TM, Cout), lambda i: (i, 0)),
        compiler_params=pltpu.CompilerParams(
            dimension_semantics=("parallel",)),
    )(x2d, w_taps, gamma2, beta2, P, PT, M, MT)

    out = out2d.reshape(Bp, Lp, Cout)[:B, :L]
    return jnp.transpose(out, (0, 2, 1))                        # (B, Cout, L)


# ----------------------------------------------------------------------------
# Pure-JAX reference (same bf16 MXU-operand rounding as the kernel)
# ----------------------------------------------------------------------------
def conv1d_gn_relu_ref(x, weight, gamma, beta, *, ng=32, eps=1e-5, act=True,
                       compute_dtype=jnp.bfloat16):
    B, Cin, L = x.shape
    Cout, _, K = weight.shape
    pad = (K - 1) // 2
    G = gcd(ng, Cout)
    cg = Cout // G
    xt = jnp.transpose(x, (0, 2, 1))
    xp = jnp.pad(xt, ((0, 0), (pad, pad), (0, 0)))
    w_taps = jnp.transpose(weight, (2, 1, 0)).astype(compute_dtype)
    out = jnp.zeros((B, L, Cout), jnp.float32)
    for t in range(K):
        out = out + jnp.einsum(
            'blc,cd->bld', xp[:, t:t + L, :].astype(compute_dtype), w_taps[t],
            preferred_element_type=jnp.float32)
    og = out.reshape(B, L, G, cg)
    mean = og.mean(axis=(1, 3), keepdims=True)
    var = jnp.mean((og - mean) ** 2, axis=(1, 3), keepdims=True)
    y = ((og - mean) * jax.lax.rsqrt(var + eps)).reshape(B, L, Cout)
    y = y * gamma.reshape(1, 1, Cout) + beta.reshape(1, 1, Cout)
    if act:
        y = jnp.maximum(y, 0.0)
    return jnp.transpose(y, (0, 2, 1))


# ----------------------------------------------------------------------------
if __name__ == "__main__":
    key = jax.random.PRNGKey(0)
    kx, kw, kg, kb = jax.random.split(key, 4)

    # Small shapes consistent with LaneGCN's ActorNet use of Conv1d.
    B, C_IN, C_OUT, L, K, NG = 16, 64, 128, 16, 3, 32
    x = jax.random.normal(kx, (B, C_IN, L), jnp.float32)
    weight = jax.random.normal(kw, (C_OUT, C_IN, K), jnp.float32) / jnp.sqrt(C_IN * K)
    gamma = 1.0 + 0.1 * jax.random.normal(kg, (C_OUT,), jnp.float32)
    beta = 0.05 * jax.random.normal(kb, (C_OUT,), jnp.float32)

    fwd = jax.jit(functools.partial(conv1d_gn_relu, ng=NG, act=True))
    out = jax.block_until_ready(fwd(x, weight, gamma, beta))

    ref = jax.block_until_ready(
        conv1d_gn_relu_ref(x, weight, gamma, beta, ng=NG, act=True))

    assert out.shape == (B, C_OUT, L), out.shape
    err = float(jnp.max(jnp.abs(out - ref)))
    assert err < 5e-2, f"max abs error too large: {err}"
    print("KERNEL_OK")
</pallas_src>

<mosaic_0001>
module attributes {stable_mosaic.version = 11 : i64} {
  func.func @_conv1d_gn_relu_kernel(%arg0: i32, %arg1: memref<128x64xf32, #tpu.memory_space<vmem>>, %arg2: memref<3x64x128xbf16, #tpu.memory_space<vmem>>, %arg3: memref<1x128xf32, #tpu.memory_space<vmem>>, %arg4: memref<1x128xf32, #tpu.memory_space<vmem>>, %arg5: memref<8x128xf32, #tpu.memory_space<vmem>>, %arg6: memref<128x8xf32, #tpu.memory_space<vmem>>, %arg7: memref<128x32xf32, #tpu.memory_space<vmem>>, %arg8: memref<32x128xf32, #tpu.memory_space<vmem>>, %arg9: memref<128x128xf32, #tpu.memory_space<vmem>>) attributes {dimension_semantics = [#tpu.dimension_semantics<parallel>], iteration_bounds = array<i64: 2>, scalar_prefetch = 0 : i64, scratch_operands = 0 : i64, tpu.core_type = #tpu.core_type<tc>, window_params = [{transform_indices = @transform_0, window_bounds = array<i64: 128, 64>}, {pipeline_mode = #tpu.pipeline_mode<synchronous>, transform_indices = @transform_1, window_bounds = array<i64: 3, 64, 128>}, {pipeline_mode = #tpu.pipeline_mode<synchronous>, transform_indices = @transform_2, window_bounds = array<i64: 1, 128>}, {pipeline_mode = #tpu.pipeline_mode<synchronous>, transform_indices = @transform_3, window_bounds = array<i64: 1, 128>}, {pipeline_mode = #tpu.pipeline_mode<synchronous>, transform_indices = @transform_4, window_bounds = array<i64: 8, 128>}, {pipeline_mode = #tpu.pipeline_mode<synchronous>, transform_indices = @transform_5, window_bounds = array<i64: 128, 8>}, {pipeline_mode = #tpu.pipeline_mode<synchronous>, transform_indices = @transform_6, window_bounds = array<i64: 128, 32>}, {pipeline_mode = #tpu.pipeline_mode<synchronous>, transform_indices = @transform_7, window_bounds = array<i64: 32, 128>}, {transform_indices = @transform_8, window_bounds = array<i64: 128, 128>}]} {
    %c0 = arith.constant 0 : index
    %c0_0 = arith.constant 0 : index
    %0 = vector.load %arg1[%c0, %c0_0] : memref<128x64xf32, #tpu.memory_space<vmem>>, vector<128x64xf32>
    %1 = tpu.iota {dimensions = array<i32: 0>} : vector<128x1xi32>
    %c16_i32 = arith.constant 16 : i32
    %c0_i32 = arith.constant 0 : i32
    %2 = arith.cmpi eq, %c16_i32, %c0_i32 : i32
    %c1_i32 = arith.constant 1 : i32
    %3 = arith.select %2, %c1_i32, %c16_i32 : i32
    %4 = vector.broadcast %3 : i32 to vector<128x1xi32>
    %5 = arith.remsi %1, %4 : vector<128x1xi32>
    %c0_i32_1 = arith.constant 0 : i32
    %6 = vector.broadcast %c0_i32_1 : i32 to vector<128x1xi32>
    %7 = arith.cmpi ne, %5, %6 : vector<128x1xi32>
    %c0_i32_2 = arith.constant 0 : i32
    %8 = vector.broadcast %c0_i32_2 : i32 to vector<128x1xi32>
    %9 = arith.cmpi slt, %5, %8 : vector<128x1xi32>
    %c0_i32_3 = arith.constant 0 : i32
    %10 = arith.cmpi slt, %3, %c0_i32_3 : i32
    %11 = vector.broadcast %10 : i1 to vector<128x1xi1>
    %12 = vector.broadcast %11 : vector<128x1xi1> to vector<128x1xi1>
    %13 = arith.xori %9, %12 : vector<128x1xi1>
    %14 = arith.andi %13, %7 : vector<128x1xi1>
    %15 = vector.broadcast %3 : i32 to vector<128x1xi32>
    %16 = arith.addi %5, %15 : vector<128x1xi32>
    %17 = arith.select %14, %16, %5 : vector<128x1xi1>, vector<128x1xi32>
    %cst = arith.constant 0.000000e+00 : f32
    %18 = vector.broadcast %cst : f32 to vector<128x128xf32>
    %cst_4 = arith.constant 0.000000e+00 : f32
    %19 = vector.broadcast %cst_4 : f32 to vector<1x64xf32>
    %20 = vector.extract_strided_slice %0 {offsets = [0, 0], sizes = [127, 64], strides = [1, 1]} : vector<128x64xf32> to vector<127x64xf32>
    %21 = tpu.concatenate %19, %20 in 0 : vector<1x64xf32>, vector<127x64xf32> -> vector<128x64xf32>
    %c1_i32_5 = arith.constant 1 : i32
    %22 = vector.broadcast %c1_i32_5 : i32 to vector<128x1xi32>
    %23 = arith.cmpi slt, %17, %22 : vector<128x1xi32>
    %cst_6 = arith.constant 0.000000e+00 : f32
    %24 = vector.shape_cast %23 : vector<128x1xi1> to vector<128x1xi1>
    %25 = vector.broadcast %24 : vector<128x1xi1> to vector<128x64xi1>
    %26 = vector.broadcast %cst_6 : f32 to vector<128x64xf32>
    %27 = arith.select %25, %26, %21 : vector<128x64xi1>, vector<128x64xf32>
    %28 = arith.truncf %27 : vector<128x64xf32> to vector<128x64xbf16>
    %c0_7 = arith.constant 0 : index
    %c0_8 = arith.constant 0 : index
    %c0_9 = arith.constant 0 : index
    %29 = vector.load %arg2[%c0_7, %c0_8, %c0_9] : memref<3x64x128xbf16, #tpu.memory_space<vmem>>, vector<1x64x128xbf16>
    %30 = vector.shape_cast %29 : vector<1x64x128xbf16> to vector<64x128xbf16>
    %cst_10 = arith.constant dense<0.000000e+00> : vector<128x128xf32>
    %31 = tpu.matmul %28, %30, %cst_10 {dimension_numbers = #tpu.dot_dimension_numbers<[1], [0], [0], [1], [0, 0, 1, 1], [], []>} : vector<128x64xbf16>, vector<64x128xbf16>, vector<128x128xf32> -> vector<128x128xf32>
    %32 = arith.addf %18, %31 : vector<128x128xf32>
    %33 = arith.truncf %0 : vector<128x64xf32> to vector<128x64xbf16>
    %c1 = arith.constant 1 : index
    %c0_11 = arith.constant 0 : index
    %c0_12 = arith.constant 0 : index
    %34 = vector.load %arg2[%c1, %c0_11, %c0_12] : memref<3x64x128xbf16, #tpu.memory_space<vmem>>, vector<1x64x128xbf16>
    %35 = vector.shape_cast %34 : vector<1x64x128xbf16> to vector<64x128xbf16>
    %cst_13 = arith.constant dense<0.000000e+00> : vector<128x128xf32>
    %36 = tpu.matmul %33, %35, %cst_13 {dimension_numbers = #tpu.dot_dimension_numbers<[1], [0], [0], [1], [0, 0, 1, 1], [], []>} : vector<128x64xbf16>, vector<64x128xbf16>, vector<128x128xf32> -> vector<128x128xf32>
    %37 = arith.addf %32, %36 : vector<128x128xf32>
    %38 = vector.extract_strided_slice %0 {offsets = [1, 0], sizes = [127, 64], strides = [1, 1]} : vector<128x64xf32> to vector<127x64xf32>
    %cst_14 = arith.constant 0.000000e+00 : f32
    %39 = vector.broadcast %cst_14 : f32 to vector<1x64xf32>
    %40 = tpu.concatenate %38, %39 in 0 : vector<127x64xf32>, vector<1x64xf32> -> vector<128x64xf32>
    %c15_i32 = arith.constant 15 : i32
    %41 = vector.broadcast %c15_i32 : i32 to vector<128x1xi32>
    %42 = arith.cmpi sge, %17, %41 : vector<128x1xi32>
    %cst_15 = arith.constant 0.000000e+00 : f32
    %43 = vector.shape_cast %42 : vector<128x1xi1> to vector<128x1xi1>
    %44 = vector.broadcast %43 : vector<128x1xi1> to vector<128x64xi1>
    %45 = vector.broadcast %cst_15 : f32 to vector<128x64xf32>
    %46 = arith.select %44, %45, %40 : vector<128x64xi1>, vector<128x64xf32>
    %47 = arith.truncf %46 : vector<128x64xf32> to vector<128x64xbf16>
    %c2 = arith.constant 2 : index
    %c0_16 = arith.constant 0 : index
    %c0_17 = arith.constant 0 : index
    %48 = vector.load %arg2[%c2, %c0_16, %c0_17] : memref<3x64x128xbf16, #tpu.memory_space<vmem>>, vector<1x64x128xbf16>
    %49 = vector.shape_cast %48 : vector<1x64x128xbf16> to vector<64x128xbf16>
    %cst_18 = arith.constant dense<0.000000e+00> : vector<128x128xf32>
    %50 = tpu.matmul %47, %49, %cst_18 {dimension_numbers = #tpu.dot_dimension_numbers<[1], [0], [0], [1], [0, 0, 1, 1], [], []>} : vector<128x64xbf16>, vector<64x128xbf16>, vector<128x128xf32> -> vector<128x128xf32>
    %51 = arith.addf %37, %50 : vector<128x128xf32>
    %c0_19 = arith.constant 0 : index
    %c0_20 = arith.constant 0 : index
    %52 = vector.load %arg5[%c0_19, %c0_20] : memref<8x128xf32, #tpu.memory_space<vmem>>, vector<8x128xf32>
    %c0_21 = arith.constant 0 : index
    %c0_22 = arith.constant 0 : index
    %53 = vector.load %arg6[%c0_21, %c0_22] : memref<128x8xf32, #tpu.memory_space<vmem>>, vector<128x8xf32>
    %c0_23 = arith.constant 0 : index
    %c0_24 = arith.constant 0 : index
    %54 = vector.load %arg7[%c0_23, %c0_24] : memref<128x32xf32, #tpu.memory_space<vmem>>, vector<128x32xf32>
    %c0_25 = arith.constant 0 : index
    %c0_26 = arith.constant 0 : index
    %55 = vector.load %arg8[%c0_25, %c0_26] : memref<32x128xf32, #tpu.memory_space<vmem>>, vector<32x128xf32>
    %cst_27 = arith.constant dense<0.000000e+00> : vector<8x128xf32>
    %56 = tpu.matmul %52, %51, %cst_27 {dimension_numbers = #tpu.dot_dimension_numbers<[1], [0], [0], [1], [0, 0, 1, 1], [], []>} : vector<8x128xf32>, vector<128x128xf32>, vector<8x128xf32> -> vector<8x128xf32>
    %cst_28 = arith.constant dense<0.000000e+00> : vector<8x32xf32>
    %57 = tpu.matmul %56, %54, %cst_28 {dimension_numbers = #tpu.dot_dimension_numbers<[1], [0], [0], [1], [0, 0, 1, 1], [], []>} : vector<8x128xf32>, vector<128x32xf32>, vector<8x32xf32> -> vector<8x32xf32>
    %cst_29 = arith.constant 1.562500e-02 : f32
    %58 = vector.broadcast %cst_29 : f32 to vector<8x32xf32>
    %59 = arith.mulf %57, %58 : vector<8x32xf32>
    %cst_30 = arith.constant dense<0.000000e+00> : vector<8x128xf32>
    %60 = tpu.matmul %59, %55, %cst_30 {dimension_numbers = #tpu.dot_dimension_numbers<[1], [0], [0], [1], [0, 0, 1, 1], [], []>} : vector<8x32xf32>, vector<32x128xf32>, vector<8x128xf32> -> vector<8x128xf32>
    %cst_31 = arith.constant dense<0.000000e+00> : vector<128x128xf32>
    %61 = tpu.matmul %53, %60, %cst_31 {dimension_numbers = #tpu.dot_dimension_numbers<[1], [0], [0], [1], [0, 0, 1, 1], [], []>} : vector<128x8xf32>, vector<8x128xf32>, vector<128x128xf32> -> vector<128x128xf32>
    %62 = arith.subf %51, %61 : vector<128x128xf32>
    %63 = arith.mulf %62, %62 : vector<128x128xf32>
    %cst_32 = arith.constant dense<0.000000e+00> : vector<8x128xf32>
    %64 = tpu.matmul %52, %63, %cst_32 {dimension_numbers = #tpu.dot_dimension_numbers<[1], [0], [0], [1], [0, 0, 1, 1], [], []>} : vector<8x128xf32>, vector<128x128xf32>, vector<8x128xf32> -> vector<8x128xf32>
    %cst_33 = arith.constant dense<0.000000e+00> : vector<8x32xf32>
    %65 = tpu.matmul %64, %54, %cst_33 {dimension_numbers = #tpu.dot_dimension_numbers<[1], [0], [0], [1], [0, 0, 1, 1], [], []>} : vector<8x128xf32>, vector<128x32xf32>, vector<8x32xf32> -> vector<8x32xf32>
    %cst_34 = arith.constant 1.562500e-02 : f32
    %66 = vector.broadcast %cst_34 : f32 to vector<8x32xf32>
    %67 = arith.mulf %65, %66 : vector<8x32xf32>
    %cst_35 = arith.constant 9.99999974E-6 : f32
    %68 = vector.broadcast %cst_35 : f32 to vector<8x32xf32>
    %69 = arith.addf %67, %68 : vector<8x32xf32>
    %70 = math.rsqrt %69 : vector<8x32xf32>
    %cst_36 = arith.constant dense<0.000000e+00> : vector<8x128xf32>
    %71 = tpu.matmul %70, %55, %cst_36 {dimension_numbers = #tpu.dot_dimension_numbers<[1], [0], [0], [1], [0, 0, 1, 1], [], []>} : vector<8x32xf32>, vector<32x128xf32>, vector<8x128xf32> -> vector<8x128xf32>
    %cst_37 = arith.constant dense<0.000000e+00> : vector<128x128xf32>
    %72 = tpu.matmul %53, %71, %cst_37 {dimension_numbers = #tpu.dot_dimension_numbers<[1], [0], [0], [1], [0, 0, 1, 1], [], []>} : vector<128x8xf32>, vector<8x128xf32>, vector<128x128xf32> -> vector<128x128xf32>
    %73 = arith.mulf %62, %72 : vector<128x128xf32>
    %c0_38 = arith.constant 0 : index
    %c0_39 = arith.constant 0 : index
    %74 = vector.load %arg3[%c0_38, %c0_39] : memref<1x128xf32, #tpu.memory_space<vmem>>, vector<1x128xf32>
    %75 = vector.broadcast %74 : vector<1x128xf32> to vector<128x128xf32>
    %76 = arith.mulf %73, %75 : vector<128x128xf32>
    %c0_40 = arith.constant 0 : index
    %c0_41 = arith.constant 0 : index
    %77 = vector.load %arg4[%c0_40, %c0_41] : memref<1x128xf32, #tpu.memory_space<vmem>>, vector<1x128xf32>
    %78 = vector.broadcast %77 : vector<1x128xf32> to vector<128x128xf32>
    %79 = arith.addf %76, %78 : vector<128x128xf32>
    %cst_42 = arith.constant 0.000000e+00 : f32
    %80 = vector.broadcast %cst_42 : f32 to vector<128x128xf32>
    %81 = arith.maximumf %79, %80 : vector<128x128xf32>
    %c0_43 = arith.constant 0 : index
    %c0_44 = arith.constant 0 : index
    %82 = vector.load %arg9[%c0_43, %c0_44] : memref<128x128xf32, #tpu.memory_space<vmem>>, vector<128x128xf32>
    tpu.vector_store %arg9[%c0_43, %c0_44], %81 {strides = array<i32>} : memref<128x128xf32, #tpu.memory_space<vmem>>, vector<128x128xf32>,
    return
  }
  func.func @transform_0(%arg0: i32) -> (i32, i32) {
    %c0_i32 = arith.constant 0 : i32
    %c0_i32_0 = arith.constant 0 : i32
    return %arg0, %c0_i32 : i32, i32
  }
  func.func @transform_1(%arg0: i32) -> (i32, i32, i32) {
    %c0_i32 = arith.constant 0 : i32
    %c0_i32_0 = arith.constant 0 : i32
    %c0_i32_1 = arith.constant 0 : i32
    %c0_i32_2 = arith.constant 0 : i32
    return %c0_i32, %c0_i32_0, %c0_i32_1 : i32, i32, i32
  }
  func.func @transform_2(%arg0: i32) -> (i32, i32) {
    %c0_i32 = arith.constant 0 : i32
    %c0_i32_0 = arith.constant 0 : i32
    %c0_i32_1 = arith.constant 0 : i32
    return %c0_i32, %c0_i32_0 : i32, i32
  }
  func.func @transform_3(%arg0: i32) -> (i32, i32) {
    %c0_i32 = arith.constant 0 : i32
    %c0_i32_0 = arith.constant 0 : i32
    %c0_i32_1 = arith.constant 0 : i32
    return %c0_i32, %c0_i32_0 : i32, i32
  }
  func.func @transform_4(%arg0: i32) -> (i32, i32) {
    %c0_i32 = arith.constant 0 : i32
    %c0_i32_0 = arith.constant 0 : i32
    %c0_i32_1 = arith.constant 0 : i32
    return %c0_i32, %c0_i32_0 : i32, i32
  }
  func.func @transform_5(%arg0: i32) -> (i32, i32) {
    %c0_i32 = arith.constant 0 : i32
    %c0_i32_0 = arith.constant 0 : i32
    %c0_i32_1 = arith.constant 0 : i32
    return %c0_i32, %c0_i32_0 : i32, i32
  }
  func.func @transform_6(%arg0: i32) -> (i32, i32) {
    %c0_i32 = arith.constant 0 : i32
    %c0_i32_0 = arith.constant 0 : i32
    %c0_i32_1 = arith.constant 0 : i32
    return %c0_i32, %c0_i32_0 : i32, i32
  }
  func.func @transform_7(%arg0: i32) -> (i32, i32) {
    %c0_i32 = arith.constant 0 : i32
    %c0_i32_0 = arith.constant 0 : i32
    %c0_i32_1 = arith.constant 0 : i32
    return %c0_i32, %c0_i32_0 : i32, i32
  }
  func.func @transform_8(%arg0: i32) -> (i32, i32) {
    %c0_i32 = arith.constant 0 : i32
    %c0_i32_0 = arith.constant 0 : i32
    return %arg0, %c0_i32 : i32, i32
  }
}

</mosaic_0001>

<bundles_post_ra>
// kernel: conv1d_gn_relu.1
= control target key start
LH: loop header
LB: loop body
LE: loop exit
PB: predicated region body
PF: predicated region fallthrough
CT: control target
= control target key end

     0   :  { %13 = vsyncpa [#allocation3], 0  ;;  %s2711_s0 = inlined_call_operand.vmem [shape: f32[256,64], index: 0, kind: input, shape index: {}]   ;;  %s2712_s1 = inlined_call_operand.vmem [shape: bf16[3,64,128], index: 1, kind: input, shape index: {}]   ;;  %s2713_s2 = inlined_call_operand.vmem [shape: f32[1,128], index: 2, kind: input, shape index: {}]   ;;  %s2714_s3 = inlined_call_operand.vmem [shape: f32[1,128], index: 3, kind: input, shape index: {}]   ;;  %s2715_s4 = inlined_call_operand.vmem [shape: f32[8,128], index: 4, kind: input, shape index: {}]   ;;  %s2716_s5 = inlined_call_operand.vmem [shape: f32[128,8], index: 5, kind: input, shape index: {}]   ;;  %s2717_s6 = inlined_call_operand.vmem [shape: f32[128,32], index: 6, kind: input, shape index: {}]   ;;  %s2718_s7 = inlined_call_operand.vmem [shape: f32[32,128], index: 7, kind: input, shape index: {}]   ;;  %s2719_s8 = inlined_call_operand.hbm [shape: f32[256,128], index: 8, kind: output, shape index: {}]  }
   0x1   :  { %15 = vsyncpa [#allocation3 + $0x1], 0  ;;  %s2002_s27 = smov 0   ;;  %s2004_s28 = smov 0  }
   0x2   :  { %s2006_s29 = smov 0   ;;  %s2008_s30 = smov 0  }
   0x3 LB: > { %s2023_s9 = sadd.s32 4294967295, %s1953_s30   ;;  %s1687_s10 = sadd.s32 4294967294, %s1953_s30   ;;  %s1953_s30 = sphi %s2008_s30, %s2725_s30   ;;  %s1949_s29 = sphi %s2006_s29, %s2724_s29   ;;  %s1945_s28 = sphi %s2004_s28, %s2723_s28   ;;  %s1941_s27 = sphi %s2002_s27, %s2722_s27  }
   0x4   : > { %s2027_s11 = sadd.s32 1, %s1953_s30   ;;  %s201_s12 = sadd.s32 1, %s1949_s29 }
   0x5   : > { %s198_s13 = ssub.s32 %s1953_s30, %s2027_s11  ;;  %p211_p0 = scmp.ne.s32.totalorder %s1949_s29, %s1945_s28 }
   0x6   : > { %p199_p1 = scmp.eq.s32.totalorder %s198_s13, 0  ;;  %p212_p2 = scmp.eq.s32.totalorder %s2023_s9, 1 }
   0x7   : > { %p217_p3 = scmp.ne.s32.totalorder %s1945_s28, %s1941_s27  ;;  %p218_p4 = scmp.eq.s32.totalorder %s1687_s10, 1 }
   0x8   : > { %s2038_s14 = scalar_select %p199_p1, %s1949_s29, %s201_s12  }
   0x9   : > { %p2040_p5 = por %p212_p2, %p211_p0  ;;  %p2044_p6 = por %p218_p4, %p217_p3 }
   0xa   : > { %p1690_p7 = scmp.ge.s32.totalorder %s1953_s30, 1  ;;  %p266_p8 = scmp.lt.s32.totalorder %s1953_s30, 3 }
   0xc   : > { %p267_p9 = pnand %p1690_p7, %p266_p8 }
   0xd   : > { %s1692_s19 = sshll.u32 (!%p267_p9), %s2023_s9, 4  ;;  %s1833_s23 = sshll.u32 (!%p267_p9), %s2023_s9, 7 }
   0xe   : > { %270 = sbr.rel (%p267_p9) target bundleno = 1715 (0x6b3), region = 52  ;;  %p301_p10 = scmp.lt.s32.totalorder (!%p267_p9), %s1692_s19, 31 }
   0xf   : > { %s1621_s26 = scalar_lea.hbm (!%p267_p9), %s2719_s8, %s1833_s23 }
  0x10   : > { %s1624_s13 = sshll.u32 (!%p267_p9), %s1621_s26, 4  ;;  %s1625_s13 = int_to_ptr.hbm [resolvable:$true] %s1624_s13 }
  0x11   : > { %s1905_s17 = sshra.s32 (!%p267_p9), %s1625_s13, 4  ;;  %s1906_s17 = int_to_ptr.hbm [resolvable:$true] %s1905_s17 }
  0x12   : > { %s1907_s18 = scalar_lea.hbm (!%p267_p9), %s1906_s17, 128  ;;  %p1912_p0 = scmp.lt.s32.totalorder (!%p267_p9), %s1906_s17, %s2719_s8 }
  0x13   : > { %v1828_v0 = vld [vmem:[%s2712_s1 + $0x38] sm:$0xff]  ;;  %v1827_v1 = vld [vmem:[%s2712_s1 + $0x30] sm:$0xff]  ;;  %s2727_s19 = smov (!%p301_p10, %s1692_s19), 31  ;;  %v1826_v2 = vld [vmem:[%s2712_s1 + $0x28] sm:$0xff]  ;;  %vm719_vm0 = vcmask 523264   ;;  %v324_v20 = vlaneseq  ;;  %vm890_vm1 = vcmask 1046528   ;;  %p1908_p11 = scmp.ne.s32.totalorder %s1906_s17, %s1907_s18 }
  0x14   : > { %1834 = vmatpush.bf16.msra.mxu1 %v1828_v0  ;;  %1835 = vmatpush.bf16.msra.mxu2 %v1828_v0  ;;  %s1693_s22 = sshll.u32 %s2727_s19, 3  ;;  %v1825_v3 = vld [vmem:[%s2712_s1 + $0x20] sm:$0xff]  ;;  %v1832_v8 = vld [vmem:[%s2712_s1 + $0x58] sm:$0xff]  ;;  %v1831_v11 = vld [vmem:[%s2712_s1 + $0x50] sm:$0xff]  ;;  %vm549_vm3 = vcmask 1040384   ;;  %s297_s19 = sand.u32 1, %s1945_s28  }
  0x15   : > { %748 = vmatpush.bf16.msra.mxu0 %v1828_v0  ;;  %1836 = vmatpush.bf16.msra.mxu3 %v1828_v0  ;;  %s2063_s10 = scalar_lea.vmem %s2711_s0, %s1693_s22  ;;  %v1824_v12 = vld [vmem:[%s2712_s1 + $0x18] sm:$0xff]  ;;  %v1823_v15 = vld [vmem:[%s2712_s1 + $0x10] sm:$0xff]  ;;  %v1830_v17 = vld [vmem:[%s2712_s1 + $0x48] sm:$0xff]  ;;  %v2131_v26 = vshrl.u32 %v324_v20, 7  ;;  %s1691_s21 = sshll.u32 %s297_s19, 7 }
  0x16   : > { %v2069_v4 = vld [vmem:[%s2063_s10 + $0x20] sm:$0xff]  ;;  %v2072_v5 = vld [vmem:[%s2063_s10 + $0x28] sm:$0xff]  ;;  %v2075_v6 = vld [vmem:[%s2063_s10 + $0x50] sm:$0xff]  ;;  %s2615_s22 = scalar_lea.vmem [#allocation2], %s1691_s21  ;;  %s1610_s9 = scalar_lea.sflag [#allocation3], %s297_s19 }
  0x17   : > { %v2078_v7 = vld [vmem:[%s2063_s10 + $0x58] sm:$0xff]  ;;  %v680_v9 = vpack.c.bf16 %v2072_v5, %v2069_v4  ;;  %v2096_v13 = vld [vmem:[%s2063_s10] sm:$0xff]  ;;  %v2099_v14 = vld [vmem:[%s2063_s10 + $0x8] sm:$0xff]  ;;  %v326_v29 = vadd.s32 8, %v2131_v26  ;;  %v557_v44 = vrot.slane %v2069_v4, 7  ;;  %v559_v45 = vrot.slane %v2072_v5, 7  ;;  %p1909_p12 = pnand %p1908_p11, %p2040_p5 }
  0x18   : > { %1837 = vmatpush.bf16.msra.mxu1 %v1827_v1  ;;  %1838 = vmatpush.bf16.msra.mxu2 %v1827_v1  ;;  %v683_v10 = vpack.c.bf16 %v2078_v7, %v2075_v6  ;;  %v678_v16 = vpack.c.bf16 %v2099_v14, %v2096_v13  ;;  %v1822_v18 = vld [vmem:[%s2712_s1 + $0x8] sm:$0xff]  ;;  %v1829_v19 = vld [vmem:[%s2712_s1 + $0x40] sm:$0xff]  ;;  %v2117_v21 = vld [vmem:[%s2063_s10 + $0x30] sm:$0xff]  ;;  %v892_v34 = vrot.slane %v2099_v14, 1  ;;  %v891_v36 = vrot.slane %v2096_v13, 1  ;;  %s1622_s12 = sshll.u32 %s2615_s22, 4  ;;  %s1623_s12 = int_to_ptr.vmem [resolvable:$true] %s1622_s12 }
  0x19   : > { %749 = vmatpush.bf16.msra.mxu0 %v1827_v1  ;;  %1839 = vmatpush.bf16.msra.mxu3 %v1827_v1  ;;  %v2120_v22 = vld [vmem:[%s2063_s10 + $0x38] sm:$0xff]  ;;  %v2123_v23 = vld [vmem:[%s2063_s10 + $0x60] sm:$0xff]  ;;  %v2126_v24 = vld [vmem:[%s2063_s10 + $0x68] sm:$0xff]  ;;  %v352_v33 = vand.u32 15, %v326_v29  ;;  %v328_v46 = vadd.s32 24, %v2131_v26  ;;  %v329_v48 = vadd.s32 32, %v2131_v26  ;;  %v560_v52 = vsel %vm549_vm3, %v557_v44, %v559_v45  ;;  %p1910_p13 = pneg %p1909_p12 }
  0x1a   : > { %v1821_v25 = vld [vmem:[%s2712_s1] sm:$0xff]  ;;  %v681_v27 = vpack.c.bf16 %v2120_v22, %v2117_v21  ;;  %v684_v28 = vpack.c.bf16 %v2126_v24, %v2123_v23  ;;  %v2139_v30 = vld [vmem:[%s2063_s10 + $0x10] sm:$0xff]  ;;  %v2142_v31 = vld [vmem:[%s2063_s10 + $0x18] sm:$0xff]  ;;  %v893_v40 = vsel %vm890_vm1, %v891_v36, %v892_v34  ;;  %v898_v49 = vrot.slane %v2069_v4, 1  ;;  %s1911_s21 = scalar_lea.hbm %s2719_s8, 256 }
  0x1b   : > { %v679_v32 = vpack.c.bf16 %v2142_v31, %v2139_v30  ;;  %v894_v35 = vrot.slane %v2139_v30, 1  ;;  %vm940_vm2 = vcmp.ge.s32.totalorder %v352_v33, 15  ;;  %v2154_v38 = vld [vmem:[%s2063_s10 + $0x40] sm:$0xff]  ;;  %v2157_v39 = vld [vmem:[%s2063_s10 + $0x48] sm:$0xff]  ;;  %v555_v47 = vrot.slane %v2142_v31, 7  ;;  %p1913_p1 = scmp.lt.s32.totalorder %s1911_s21, %s1907_s18 }
  0x1c   : > { %1840 = vmatpush.bf16.msra.mxu1 %v1826_v2  ;;  %1841 = vmatpush.bf16.msra.mxu2 %v1826_v2  ;;  %v682_v42 = vpack.c.bf16 %v2157_v39, %v2154_v38  ;;  %v345_v50 = vand.u32 15, %v2131_v26  ;;  %v550_v51 = vrot.slane %v2096_v13, 7  ;;  %v366_v53 = vand.u32 15, %v328_v46 }
  0x1d   : > { %750 = vmatpush.bf16.msra.mxu0 %v1826_v2  ;;  %1842 = vmatpush.bf16.msra.mxu3 %v1826_v2  ;;  %v895_v37 = vsel %vm890_vm1, %v892_v34, %v894_v35  ;;  %v896_v54 = vrot.slane %v2142_v31, 1  ;;  %v373_v55 = vand.u32 15, %v329_v48  ;;  %v558_v56 = vsel %vm549_vm3, %v555_v47, %v557_v44  ;;  %p1914_p2 = por %p1913_p1, %p1912_p0 }
  0x1e   : > { %v988_v41 = vsel %vm940_vm2, 0.0, %v895_v37  ;;  %v551_v57 = vrot.slane %v2099_v14, 7  ;;  %vm598_vm5 = vcmp.lt.s32.totalorder %v345_v50, 1  ;;  %v597_v59 = vsel %vm549_vm3, 0.0, %v550_v51 }
  0x1f   : > { %v1003_v43 = vpack.c.bf16 %v988_v41, %v893_v40  ;;  %vm602_vm4 = vcmp.lt.s32.totalorder %v373_v55, 1  ;;  %v899_v60 = vsel %vm890_vm1, %v896_v54, %v898_v49  ;;  %vm942_vm6 = vcmp.ge.s32.totalorder %v366_v53, 15  ;;  %p1915_p3 = pnand %p1914_p2, %p1910_p13 }
  0x20   : > { %1843 = vmatpush.bf16.msra.mxu1 %v1825_v3  ;;  %1844 = vmatpush.bf16.msra.mxu2 %v1825_v3  ;;  %v650_v58 = vsel %vm602_vm4, 0.0, %v558_v56  ;;  %v552_v62 = vsel %vm549_vm3, %v550_v51, %v551_v57  ;;  %v646_v63 = vsel %vm598_vm5, 0.0, %v597_v59  ;;  %v897_v0 = vsel %vm890_vm1, %v894_v35, %v896_v54 }
  0x21   : > { %751 = vmatpush.bf16.msra.mxu0 %v1825_v3  ;;  %1845 = vmatpush.bf16.msra.mxu3 %v1825_v3  ;;  %v664_v61 = vpack.c.bf16 %v560_v52, %v650_v58  ;;  %v990_v1 = vsel %vm942_vm6, 0.0, %v899_v60  ;;  %v662_v2 = vpack.c.bf16 %v552_v62, %v646_v63  ;;  %v561_v4 = vrot.slane %v2117_v21, 7 }
  0x22   : > { %v1004_v3 = vpack.c.bf16 %v990_v1, %v897_v0  ;;  %v553_v13 = vrot.slane %v2139_v30, 7  ;;  %v565_v33 = vrot.slane %v2154_v38, 7  ;;  %v567_v34 = vrot.slane %v2157_v39, 7 }
  0x23   : > { %1720 = vmatmul.msk.bf16.vlgmr.msra.gmra.mxu1 %vm719_vm0, %v680_v9  ;;  %1723 = vmatmul.msk.bf16.vlgmr.msra.gmra.mxu2 %vm719_vm0, %v683_v10  ;;  %v327_v9 = vadd.s32 16, %v2131_v26  ;;  %v330_v10 = vadd.s32 40, %v2131_v26  ;;  %v562_v14 = vsel %vm549_vm3, %v559_v45, %v561_v4  ;;  %v332_v35 = vadd.s32 56, %v2131_v26 }
  0x24   : > { %1072 = vmatpush.bf16.msrb.mxu2 %v1832_v8  ;;  %845 = vmatpush.bf16.msrb.mxu1 %v1824_v12  ;;  %v563_v8 = vrot.slane %v2120_v22, 7  ;;  %v900_v12 = vrot.slane %v2072_v5, 1  ;;  %v554_v20 = vsel %vm549_vm3, %v551_v57, %v553_v13  ;;  %v333_v36 = vadd.s32 64, %v2131_v26 }
  0x25   : > { %1718 = vmatmul.msk.bf16.vlgmr.msra.gmra.mxu0 %vm719_vm0, %v678_v16  ;;  %v902_v16 = vrot.slane %v2117_v21, 1  ;;  %v568_v40 = vsel %vm549_vm3, %v565_v33, %v567_v34  ;;  %v904_v41 = vrot.slane %v2120_v22, 1  ;;  %v912_v50 = vrot.slane %v2078_v7, 1 }
  0x26   : > { %v901_v30 = vsel %vm890_vm1, %v898_v49, %v900_v12  ;;  %v566_v37 = vsel %vm549_vm3, %v563_v8, %v565_v33  ;;  %v401_v44 = vand.u32 15, %v333_v36  ;;  %v914_v51 = vrot.slane %v2123_v23, 1 }
  0x27   : > { %v905_v48 = vsel %vm890_vm1, %v902_v16, %v904_v41  ;;  %v336_v22 = vadd.s32 88, %v2131_v26  ;;  %v334_v53 = vadd.s32 72, %v2131_v26  ;;  %v908_v58 = vrot.slane %v2157_v39, 1 }
  0x28   : > { %1073 = vmatpush.bf16.msrb.mxu2 %v1831_v11  ;;  %846 = vmatpush.bf16.msrb.mxu1 %v1823_v15  ;;  %v331_v11 = vadd.s32 48, %v2131_v26  ;;  %v564_v15 = vsel %vm549_vm3, %v561_v4, %v563_v8  ;;  %vm606_vm10 = vcmp.lt.s32.totalorder %v401_v44, 1  ;;  %v915_v56 = vsel %vm890_vm1, %v912_v50, %v914_v51 }
  0x29   : > { %v654_v45 = vsel %vm606_vm10, 0.0, %v566_v37  ;;  %v422_v54 = vand.u32 15, %v336_v22  ;;  %v408_v59 = vand.u32 15, %v334_v53  ;;  %v569_v63 = vrot.slane %v2075_v6, 7 }
  0x2a   : > { %v571_v0 = vrot.slane %v2078_v7, 7  ;;  %v916_v4 = vrot.slane %v2126_v24, 1 }
  0x2b   : > { %vm950_vm12 = vcmp.ge.s32.totalorder %v422_v54, 15  ;;  %vm948_vm13 = vcmp.ge.s32.totalorder %v408_v59, 15  ;;  %v570_v39 = vsel %vm549_vm3, %v567_v34, %v569_v63 }
  0x2c   : > { %1074 = vmatpush.bf16.msrb.mxu2 %v1830_v17  ;;  %847 = vmatpush.bf16.msrb.mxu1 %v1822_v18  ;;  %v359_v17 = vand.u32 15, %v327_v9  ;;  %v380_v18 = vand.u32 15, %v330_v10  ;;  %v998_v57 = vsel %vm950_vm12, 0.0, %v915_v56  ;;  %v338_v9 = vadd.s32 104, %v2131_v26 }
  0x2d   : > { %v572_v10 = vsel %vm549_vm3, %v569_v63, %v571_v0  ;;  %v917_v7 = vsel %vm890_vm1, %v914_v51, %v916_v4 }
  0x2e   : > { %vm600_vm8 = vcmp.lt.s32.totalorder %v359_v17, 1  ;;  %vm944_vm9 = vcmp.ge.s32.totalorder %v380_v18, 15  ;;  %v573_v18 = vrot.slane %v2123_v23, 7 }
  0x2f   : > { %v648_v29 = vsel %vm600_vm8, 0.0, %v554_v20  ;;  %v575_v20 = vrot.slane %v2126_v24, 7 }
  0x30   : > { %1075 = vmatpush.bf16.msrb.mxu2 %v1829_v19  ;;  %848 = vmatpush.bf16.msrb.mxu1 %v1821_v25  ;;  %v387_v19 = vand.u32 15, %v331_v11 }
  0x32   : > { %vm604_vm7 = vcmp.lt.s32.totalorder %v387_v19, 1  ;;  %v337_v19 = vadd.s32 96, %v2131_v26 }
  0x33   : > { %1721 = vmatmul.msk.bf16.gmra.mxu1 %vm719_vm0, %v681_v27  ;;  %1724 = vmatmul.msk.bf16.gmra.mxu2 %vm719_vm0, %v684_v28  ;;  %v652_v25 = vsel %vm604_vm7, 0.0, %v562_v14  ;;  %v903_v27 = vsel %vm890_vm1, %v900_v12, %v902_v16  ;;  %v556_v28 = vsel %vm549_vm3, %v553_v13, %v555_v47  ;;  %v666_v47 = vpack.c.bf16 %v568_v40, %v654_v45 }
  0x34   : > { %v665_v5 = vpack.c.bf16 %v564_v15, %v652_v25  ;;  %v992_v31 = vsel %vm944_vm9, 0.0, %v903_v27  ;;  %v436_v13 = vand.u32 15, %v338_v9  ;;  %v429_v25 = vand.u32 15, %v337_v19 }
  0x35   : > { %1719 = vmatmul.msk.bf16.gmra.mxu0 %vm719_vm0, %v679_v32  ;;  %v663_v32 = vpack.c.bf16 %v556_v28, %v648_v29  ;;  %v1005_v21 = vpack.c.bf16 %v992_v31, %v901_v30  ;;  %v574_v27 = vsel %vm549_vm3, %v571_v0, %v573_v18  ;;  %v323_v30 = vld [vmem:[%s2063_s10 + $0x78] sm:$0xff] }
  0x36   : > { %vm952_vm15 = vcmp.ge.s32.totalorder %v436_v13, 15  ;;  %vm610_vm2 = vcmp.lt.s32.totalorder %v429_v25, 1 }
  0x37   : > { %v658_v28 = vsel %vm610_vm2, 0.0, %v574_v27 }
  0x43   : > { %1722 = vmatmul.msk.bf16.gmra.mxu1 %vm719_vm0, %v682_v42  ;;  %1774 = vmatmul.msk.bf16.vlgmr.msrb.gmra.mxu2 %vm719_vm0, %v1003_v43  ;;  %v906_v42 = vrot.slane %v2154_v38, 1  ;;  %v394_v43 = vand.u32 15, %v332_v35  ;;  %v910_v38 = vrot.slane %v2075_v6, 1  ;;  %v322_v6 = vld [vmem:[%s2063_s10 + $0x70] sm:$0xff] }
  0x44   : > { %v918_v14 = vrot.slane %v322_v6, 1  ;;  %v685_v31 = vpack.c.bf16 %v323_v30, %v322_v6  ;;  %v577_v45 = vrot.slane %v322_v6, 7 }
  0x45   : > { %v907_v46 = vsel %vm890_vm1, %v904_v41, %v906_v42  ;;  %vm946_vm11 = vcmp.ge.s32.totalorder %v394_v43, 15  ;;  %v913_v55 = vsel %vm890_vm1, %v910_v38, %v912_v50  ;;  %v911_v62 = vsel %vm890_vm1, %v908_v58, %v910_v38 }
  0x46   : > { %v994_v49 = vsel %vm946_vm11, 0.0, %v907_v46  ;;  %v1008_v60 = vpack.c.bf16 %v998_v57, %v913_v55  ;;  %v909_v1 = vsel %vm890_vm1, %v906_v42, %v908_v58  ;;  %v919_v15 = vsel %vm890_vm1, %v916_v4, %v918_v14  ;;  %1725 = vmatmul.msk.bf16.vlgmr.msra.gmra.mxu3 %vm719_vm0, %v685_v31 }
  0x47   : > { %v1006_v52 = vpack.c.bf16 %v994_v49, %v905_v48  ;;  %v1000_v16 = vsel %vm952_vm15, 0.0, %v919_v15  ;;  %v339_v43 = vadd.s32 112, %v2131_v26  ;;  %v578_v49 = vsel %vm549_vm3, %v575_v20, %v577_v45 }
  0x48   : > { %v1009_v17 = vpack.c.bf16 %v1000_v16, %v917_v7 }
  0x49   : > { %v443_v44 = vand.u32 15, %v339_v43 }
  0x53   : > { %1742 = vmatmul.msk.bf16.vlgmr.msrb.gmra.mxu1 %vm719_vm0, %v662_v2  ;;  %1775 = vmatmul.msk.bf16.gmra.mxu2 %vm719_vm0, %v1004_v3  ;;  %v996_v2 = vsel %vm948_vm13, 0.0, %v911_v62 }
  0x54   : > { %v1007_v8 = vpack.c.bf16 %v996_v2, %v909_v1 }
  0x63   : > { %1743 = vmatmul.msk.bf16.gmra.mxu1 %vm719_vm0, %v663_v32  ;;  %1776 = vmatmul.msk.bf16.gmra.mxu2 %vm719_vm0, %v1005_v21  ;;  %v340_v32 = vadd.s32 120, %v2131_v26  ;;  %v920_v21 = vrot.slane %v323_v30, 1 }
  0x65   : > { %v450_v24 = vand.u32 15, %v340_v32  ;;  %v938_v35 = vsel %vm890_vm1, %v920_v21, 0.0  ;;  %v921_v36 = vsel %vm890_vm1, %v918_v14, %v920_v21  ;;  %vm612_vm1 = vcmp.lt.s32.totalorder %v443_v44, 1 }
  0x66   : > { %v660_v51 = vsel %vm612_vm1, 0.0, %v578_v49 }
  0x67   : > { %vm954_vm4 = vcmp.ge.s32.totalorder %v450_v24, 15 }
  0x68   : > { %v1002_v37 = vsel %vm954_vm4, 0.0, %v938_v35 }
  0x69   : > { %v1010_v41 = vpack.c.bf16 %v1002_v37, %v921_v36 }
  0x73   : > { %1744 = vmatmul.msk.bf16.gmra.mxu1 %vm719_vm0, %v664_v61  ;;  %1777 = vmatmul.msk.bf16.gmra.mxu2 %vm719_vm0, %v1006_v52  ;;  %v335_v61 = vadd.s32 80, %v2131_v26 }
  0x75   : > { %v415_v3 = vand.u32 15, %v335_v61 }
  0x77   : > { %vm608_vm14 = vcmp.lt.s32.totalorder %v415_v3, 1 }
  0x78   : > { %v656_v11 = vsel %vm608_vm14, 0.0, %v570_v39 }
  0x79   : > { %v667_v12 = vpack.c.bf16 %v572_v10, %v656_v11 }
  0x83   : > { %1745 = vmatmul.msk.bf16.gmra.mxu1 %vm719_vm0, %v665_v5  ;;  %1778 = vmatmul.msk.bf16.gmra.mxu2 %vm719_vm0, %v1007_v8  ;;  %v576_v5 = vsel %vm549_vm3, %v573_v18, %v575_v20 }
  0x84   : > { %v668_v29 = vpack.c.bf16 %v576_v5, %v658_v28 }
  0x93   : > { %1746 = vmatmul.msk.bf16.gmra.mxu1 %vm719_vm0, %v666_v47  ;;  %1779 = vmatmul.msk.bf16.gmra.mxu2 %vm719_vm0, %v1008_v60  ;;  %v579_v47 = vrot.slane %v323_v30, 7 }
  0x95   : > { %v580_v50 = vsel %vm549_vm3, %v577_v45, %v579_v47  ;;  %vm1235_vm3 = vcmask 64512  }
  0x96   : > { %v669_v22 = vpack.c.bf16 %v580_v50, %v660_v51 }
  0xa0   : > { %v763_v23 = vpop.f32.mrf.mxu1 }
  0xa2   : > { %v753_v54 = vpop.f32.mrf.mxu0 }
  0xa3   : > { %1747 = vmatmul.msk.bf16.gmra.mxu1 %vm719_vm0, %v667_v12  ;;  %1780 = vmatmul.msk.bf16.gmra.mxu2 %vm719_vm0, %v1009_v17 }
  0xa6   : > { %v2244_v33 = vpop.f32.mrf.mxu2 }
  0xa8   : > { %v765_v34 = vpop.f32.mrf.mxu1 }
  0xaa   : > { %v755_v58 = vpop.f32.mrf.mxu0 }
  0xae   : > { %v2248_v40 = vpop.f32.mrf.mxu2 }
  0xb0   : > { %v768_v42 = vpop.f32.mrf.mxu1 }
  0xb2   : > { %v758_v0 = vpop.f32.mrf.mxu0 }
  0xb3   : > { %1748 = vmatmul.msk.bf16.gmra.mxu1 %vm719_vm0, %v668_v29  ;;  %1781 = vmatmul.msk.bf16.gmra.mxu2 %vm719_vm0, %v1010_v41 }
  0xb6   : > { %v2253_v46 = vpop.f32.mrf.mxu2 }
  0xb8   : > { %v770_v48 = vpop.f32.mrf.mxu1 }
  0xba   : > { %v760_v8 = vpop.f32.mrf.mxu0 }
  0xbe   : > { %v2257_v52 = vpop.f32.mrf.mxu2 }
  0xc0   : > { %v773_v26 = vpop.f32.mrf.mxu1 }
  0xc3   : > { %1749 = vmatmul.msk.bf16.gmra.mxu1 %vm719_vm0, %v669_v22  ;;  %vm1211_vm0 = vcmask 261120  }
  0xc6   : > { %v1077_v38 = vpop.f32.mrf.mxu2 }
  0xc8   : > { %v2260_v53 = vpop.f32.mrf.mxu1 }
  0xc9   : > { %v788_v44 = vpop.f32.mrf.mxu3 }
  0xce   : > { %v1079_v55 = vpop.f32.mrf.mxu2 }
  0xd0   : > { %v850_v56 = vpop.f32.mrf.mxu1 }
  0xd1   : > { %v851_v57 = vadd.f32 %v850_v56, %v753_v54  ;;  %v1165_v54 = vld [vmem:[%s2717_s6 + $0x78] sm:$0xff] }
  0xd2   : > { %1190 = vmatpush.msrb.mxu3 %v1165_v54  ;;  %1401 = vmatpush.msra.mxu1 %v1165_v54 }
  0xd3   : > { %v2262_v59 = vadd.f32 %v1077_v38, %v851_v57 }
  0xd6   : > { %v1082_v60 = vpop.f32.mrf.mxu2 }
  0xd8   : > { %v852_v62 = vpop.f32.mrf.mxu1 }
  0xd9   : > { %v853_v63 = vadd.f32 %v852_v62, %v755_v58 }
  0xdb   : > { %v2264_v61 = vadd.f32 %v1079_v55, %v853_v63  ;;  %v1164_v55 = vld [vmem:[%s2717_s6 + $0x70] sm:$0xff] }
  0xdc   : > { %1191 = vmatpush.msrb.mxu3 %v1164_v55  ;;  %1402 = vmatpush.msra.mxu1 %v1164_v55 }
  0xde   : > { %v1084_v1 = vpop.f32.mrf.mxu2 }
  0xe0   : > { %v855_v2 = vpop.f32.mrf.mxu1 }
  0xe1   : > { %v856_v3 = vadd.f32 %v855_v2, %v758_v0 }
  0xe3   : > { %v2266_v4 = vadd.f32 %v1082_v60, %v856_v3  ;;  %v1159_v3 = vld [vmem:[%s2717_s6 + $0x48] sm:$0xff] }
  0xe6   : > { %v1087_v39 = vpop.f32.mrf.mxu2 }
  0xe8   : > { %v857_v9 = vpop.f32.mrf.mxu1 }
  0xe9   : > { %v858_v10 = vadd.f32 %v857_v9, %v760_v8  ;;  %v1158_v8 = vld [vmem:[%s2717_s6 + $0x40] sm:$0xff]  ;;  %v1156_v9 = vld [vmem:[%s2717_s6 + $0x30] sm:$0xff] }
  0xeb   : > { %v2268_v11 = vadd.f32 %v1084_v1, %v858_v10  ;;  %v1155_v10 = vld [vmem:[%s2717_s6 + $0x28] sm:$0xff] }
  0xee   : > { %v1089_v6 = vpop.f32.mrf.mxu2 }
  0xf0   : > { %v860_v12 = vpop.f32.mrf.mxu1 }
  0xf1   : > { %v861_v13 = vadd.f32 %v860_v12, %v763_v23  ;;  %v1153_v12 = vld [vmem:[%s2717_s6 + $0x18] sm:$0xff] }
  0xf3   : > { %v2270_v14 = vadd.f32 %v1087_v39, %v861_v13  ;;  %v1157_v39 = vld [vmem:[%s2717_s6 + $0x38] sm:$0xff]  ;;  %v1152_v13 = vld [vmem:[%s2717_s6 + $0x10] sm:$0xff] }
  0xf6   : > { %v1092_v7 = vpop.f32.mrf.mxu2 }
  0xf8   : > { %v862_v15 = vpop.f32.mrf.mxu1 }
  0xf9   : > { %v863_v16 = vadd.f32 %v862_v15, %v765_v34  ;;  %v2362_v15 = vld [vmem:[%s2715_s4] sm:$0xff] }
  0xfb   : > { %v2272_v17 = vadd.f32 %v1089_v6, %v863_v16  ;;  %v1154_v6 = vld [vmem:[%s2717_s6 + $0x20] sm:$0xff] }
  0xfc   : > { %v1150_v16 = vld [vmem:[%s2717_s6] sm:$0xff] }
  0xfe   : > { %v1094_v18 = vpop.f32.mrf.mxu2 }
 0x100   : > { %v865_v19 = vpop.f32.mrf.mxu1 }
 0x101   : > { %v866_v20 = vadd.f32 %v865_v19, %v768_v42  ;;  %v1168_v19 = vld [vmem:[%s2718_s7 + $0x10] sm:$0xff] }
 0x103   : > { %v2274_v25 = vadd.f32 %v1092_v7, %v866_v20  ;;  %v1151_v7 = vld [vmem:[%s2717_s6 + $0x8] sm:$0xff] }
 0x106   : > { %v1097_v27 = vpop.f32.mrf.mxu2 }
 0x108   : > { %v867_v5 = vpop.f32.mrf.mxu1 }
 0x109   : > { %v868_v28 = vadd.f32 %v867_v5, %v770_v48  ;;  %v790_v48 = vpop.f32.mrf.mxu3  ;;  %v1166_v5 = vld [vmem:[%s2718_s7] sm:$0xff] }
 0x10b   : > { %v2276_v29 = vadd.f32 %v1094_v18, %v868_v28  ;;  %v1169_v18 = vld [vmem:[%s2718_s7 + $0x18] sm:$0xff] }
 0x10e   : > { %v1099_v30 = vpop.f32.mrf.mxu2 }
 0x110   : > { %v870_v31 = vpop.f32.mrf.mxu1 }
 0x111   : > { %v871_v23 = vadd.f32 %v870_v31, %v773_v26  ;;  %v2385_v31 = vld [vmem:[%s2716_s5] sm:$0xff] }
 0x113   : > { %v2278_v32 = vadd.f32 %v1097_v27, %v871_v23  ;;  %v1167_v27 = vld [vmem:[%s2718_s7 + $0x8] sm:$0xff] }
 0x116   : > { %v1102_v21 = vpop.f32.mrf.mxu2 }
 0x118   : > { %v872_v24 = vpop.f32.mrf.mxu1 }
 0x119   : > { %v873_v0 = vadd.f32 %v872_v24, %v2260_v53  ;;  %v2392_v24 = vld [vmem:[%s2716_s5 + $0x8] sm:$0xff] }
 0x11b   : > { %v2323_v53 = vadd.f32 %v1099_v30, %v873_v0 }
 0x11e   : > { %v1104_v35 = vpop.f32.mrf.mxu2 }
 0x120   : > { %v875_v34 = vpop.f32.mrf.mxu1 }
 0x121   : > { %v876_v62 = vadd.f32 %v875_v34, %v2244_v33  ;;  %v1160_v33 = vld [vmem:[%s2717_s6 + $0x50] sm:$0xff]  ;;  %v2406_v34 = vld [vmem:[%s2716_s5 + $0x18] sm:$0xff] }
 0x123   : > { %v2317_v2 = vadd.f32 %v1102_v21, %v876_v62  ;;  %v2399_v21 = vld [vmem:[%s2716_s5 + $0x10] sm:$0xff] }
 0x126   : > { %v1107_v37 = vpop.f32.mrf.mxu2 }
 0x128   : > { %v877_v36 = vpop.f32.mrf.mxu1 }
 0x129   : > { %v878_v58 = vadd.f32 %v877_v36, %v2248_v40  ;;  %v1161_v40 = vld [vmem:[%s2717_s6 + $0x58] sm:$0xff]  ;;  %v2420_v36 = vld [vmem:[%s2716_s5 + $0x28] sm:$0xff] }
 0x12b   : > { %v2311_v1 = vadd.f32 %v1104_v35, %v878_v58  ;;  %v2413_v35 = vld [vmem:[%s2716_s5 + $0x20] sm:$0xff] }
 0x12e   : > { %v1109_v42 = vpop.f32.mrf.mxu2 }
 0x130   : > { %v880_v41 = vpop.f32.mrf.mxu1 }
 0x131   : > { %v881_v56 = vadd.f32 %v880_v41, %v2253_v46  ;;  %v1162_v46 = vld [vmem:[%s2717_s6 + $0x60] sm:$0xff]  ;;  %v2434_v41 = vld [vmem:[%s2716_s5 + $0x38] sm:$0xff] }
 0x133   : > { %v2304_v63 = vadd.f32 %v1107_v37, %v881_v56  ;;  %v2427_v37 = vld [vmem:[%s2716_s5 + $0x30] sm:$0xff] }
 0x136   : > { %v1112_v45 = vpop.f32.mrf.mxu2 }
 0x138   : > { %v882_v43 = vpop.f32.mrf.mxu1 }
 0x139   : > { %v883_v26 = vadd.f32 %v882_v43, %v2257_v52  ;;  %v1163_v52 = vld [vmem:[%s2717_s6 + $0x68] sm:$0xff] }
 0x13a   : > { %1192 = vmatpush.msrb.mxu3 %v1163_v52  ;;  %1403 = vmatpush.msra.mxu1 %v1163_v52  ;;  %v2448_v43 = vld [vmem:[%s2716_s5 + $0x48] sm:$0xff] }
 0x13b   : > { %v2297_v60 = vadd.f32 %v1109_v42, %v883_v26  ;;  %v2441_v42 = vld [vmem:[%s2716_s5 + $0x40] sm:$0xff] }
 0x13c   : > { %1193 = vmatpush.msrb.mxu3 %v1162_v46  ;;  %1404 = vmatpush.msra.mxu1 %v1162_v46 }
 0x13e   : > { %v1114_v22 = vpop.f32.mrf.mxu2  ;;  %1194 = vmatpush.msrb.mxu3 %v1161_v40  ;;  %1405 = vmatpush.msra.mxu1 %v1161_v40 }
 0x140   : > { %v885_v47 = vpop.f32.mrf.mxu1  ;;  %1195 = vmatpush.msrb.mxu3 %v1160_v33  ;;  %1406 = vmatpush.msra.mxu1 %v1160_v33 }
 0x141   : > { %v886_v50 = vadd.f32 %v885_v47, %v788_v44  ;;  %v2455_v44 = vld [vmem:[%s2716_s5 + $0x50] sm:$0xff]  ;;  %v2469_v47 = vld [vmem:[%s2716_s5 + $0x60] sm:$0xff] }
 0x142   : > { %1196 = vmatpush.msrb.mxu3 %v1159_v3  ;;  %1407 = vmatpush.msra.mxu1 %v1159_v3 }
 0x143   : > { %v2290_v57 = vadd.f32 %v1112_v45, %v886_v50  ;;  %v2462_v45 = vld [vmem:[%s2716_s5 + $0x58] sm:$0xff] }
 0x144   : > { %1197 = vmatpush.msrb.mxu3 %v1158_v8  ;;  %1408 = vmatpush.msra.mxu1 %v1158_v8  ;;  %v2490_v50 = vld [vmem:[%s2716_s5 + $0x78] sm:$0xff] }
 0x146   : > { %1198 = vmatpush.msrb.mxu3 %v1157_v39  ;;  %1409 = vmatpush.msra.mxu1 %v1157_v39 }
 0x148   : > { %v887_v49 = vpop.f32.mrf.mxu1  ;;  %1199 = vmatpush.msrb.mxu3 %v1156_v9  ;;  %1410 = vmatpush.msra.mxu1 %v1156_v9 }
 0x149   : > { %v888_v51 = vadd.f32 %v887_v49, %v790_v48  ;;  %v2476_v48 = vld [vmem:[%s2716_s5 + $0x68] sm:$0xff]  ;;  %v2483_v49 = vld [vmem:[%s2716_s5 + $0x70] sm:$0xff] }
 0x14a   : > { %1200 = vmatpush.msrb.mxu3 %v1155_v10  ;;  %1411 = vmatpush.msra.mxu1 %v1155_v10 }
 0x14b   : > { %v2281_v38 = vadd.f32 %v1114_v22, %v888_v51 }
 0x14c   : > { %1201 = vmatpush.msrb.mxu3 %v1154_v6  ;;  %1412 = vmatpush.msra.mxu1 %v1154_v6 }
 0x14d   : > { %1170 = vmatpush.msra.mxu2 %v2281_v38 }
 0x14e   : > { %1202 = vmatpush.msrb.mxu3 %v1153_v12  ;;  %1413 = vmatpush.msra.mxu1 %v1153_v12 }
 0x14f   : > { %1171 = vmatpush.msra.mxu2 %v2290_v57 }
 0x150   : > { %1203 = vmatpush.msrb.mxu3 %v1152_v13  ;;  %1414 = vmatpush.msra.mxu1 %v1152_v13 }
 0x151   : > { %1172 = vmatpush.msra.mxu2 %v2297_v60 }
 0x152   : > { %1204 = vmatpush.msrb.mxu3 %v1151_v7  ;;  %1415 = vmatpush.msra.mxu1 %v1151_v7 }
 0x153   : > { %1173 = vmatpush.msra.mxu2 %v2304_v63 }
 0x154   : > { %1205 = vmatpush.msrb.mxu3 %v1150_v16  ;;  %1416 = vmatpush.msra.mxu1 %v1150_v16 }
 0x155   : > { %1174 = vmatpush.msra.mxu2 %v2311_v1 }
 0x156   : > { %1227 = vmatpush.msra.mxu3 %v1169_v18 }
 0x157   : > { %1175 = vmatpush.msra.mxu2 %v2317_v2 }
 0x158   : > { %1228 = vmatpush.msra.mxu3 %v1168_v19 }
 0x159   : > { %1176 = vmatpush.msra.mxu2 %v2323_v53 }
 0x15a   : > { %1229 = vmatpush.msra.mxu3 %v1167_v27 }
 0x15b   : > { %1177 = vmatpush.msra.mxu2 %v2278_v32 }
 0x15c   : > { %1230 = vmatpush.msra.mxu3 %v1166_v5 }
 0x15d   : > { %1178 = vmatpush.msra.mxu2 %v2276_v29 }
 0x15f   : > { %1179 = vmatpush.msra.mxu2 %v2274_v25 }
 0x161   : > { %1180 = vmatpush.msra.mxu2 %v2272_v17 }
 0x163   : > { %1181 = vmatpush.msra.mxu2 %v2270_v14 }
 0x165   : > { %1182 = vmatpush.msra.mxu2 %v2268_v11 }
 0x167   : > { %1183 = vmatpush.msra.mxu2 %v2266_v4 }
 0x169   : > { %1184 = vmatpush.msra.mxu2 %v2264_v61 }
 0x16b   : > { %1185 = vmatpush.msra.mxu2 %v2262_v59 }
 0x16c   : > { %1186 = vmatmul.f32.vlgmr.msra.gmra.mxu2 %v2362_v15 }
 0x16d   : > { %1448 = vmatpush.msrb.mxu2 %v1169_v18 }
 0x16f   : > { %1449 = vmatpush.msrb.mxu2 %v1168_v19 }
 0x171   : > { %1450 = vmatpush.msrb.mxu2 %v1167_v27 }
 0x173   : > { %1451 = vmatpush.msrb.mxu2 %v1166_v5 }
 0x1ef   : > { %v1187_v20 = vpop.f32.mrf.mxu2 }
 0x1f0   : > { %1206 = vmatmul.f32.vlgmr.msrb.gmra.mxu3 %v1187_v20 }
 0x273   : > { %v1207_v28 = vpop.f32.mrf.mxu3 }
 0x274   : > { %v1210_v30 = vmul.f32 0.015625, %v1207_v28 }
 0x276   : > { %1782 = vmatmul.msk.f32.vlgmr.msra.gmra.mxu3 %vm1211_vm0, %v1210_v30 }
 0x2f9   : > { %v1232_v23 = vpop.f32.mrf.mxu3 }
 0x2fa   : > { %1299 = vmatpush.msrb.mxu3 %v1232_v23 }
 0x2fb   : > { %1783 = vmatmul.msk.f32.vlgmr.msrb.gmra.mxu3 %vm1235_vm3, %v2385_v31 }
 0x303   : > { %1784 = vmatmul.msk.f32.gmra.mxu3 %vm1235_vm3, %v2392_v24 }
 0x30b   : > { %1785 = vmatmul.msk.f32.gmra.mxu3 %vm1235_vm3, %v2399_v21 }
 0x313   : > { %1786 = vmatmul.msk.f32.gmra.mxu3 %vm1235_vm3, %v2406_v34 }
 0x31b   : > { %1787 = vmatmul.msk.f32.gmra.mxu3 %vm1235_vm3, %v2413_v35 }
 0x323   : > { %1788 = vmatmul.msk.f32.gmra.mxu3 %vm1235_vm3, %v2420_v36 }
 0x32b   : > { %1789 = vmatmul.msk.f32.gmra.mxu3 %vm1235_vm3, %v2427_v37 }
 0x333   : > { %1790 = vmatmul.msk.f32.gmra.mxu3 %vm1235_vm3, %v2434_v41 }
 0x33b   : > { %1791 = vmatmul.msk.f32.gmra.mxu3 %vm1235_vm3, %v2441_v42 }
 0x343   : > { %1792 = vmatmul.msk.f32.gmra.mxu3 %vm1235_vm3, %v2448_v43 }
 0x34b   : > { %1793 = vmatmul.msk.f32.gmra.mxu3 %vm1235_vm3, %v2455_v44 }
 0x353   : > { %1794 = vmatmul.msk.f32.gmra.mxu3 %vm1235_vm3, %v2462_v45 }
 0x35b   : > { %1795 = vmatmul.msk.f32.gmra.mxu3 %vm1235_vm3, %v2469_v47 }
 0x363   : > { %1796 = vmatmul.msk.f32.gmra.mxu3 %vm1235_vm3, %v2476_v48 }
 0x36b   : > { %1797 = vmatmul.msk.f32.gmra.mxu3 %vm1235_vm3, %v2483_v49 }
 0x373   : > { %1798 = vmatmul.msk.f32.gmra.mxu3 %vm1235_vm3, %v2490_v50 }
 0x37e   : > { %v1301_v51 = vpop.f32.mrf.mxu3 }
 0x386   : > { %v1304_v22 = vpop.f32.mrf.mxu3 }
 0x38e   : > { %v1307_v26 = vpop.f32.mrf.mxu3 }
 0x396   : > { %v1310_v54 = vpop.f32.mrf.mxu3 }
 0x39e   : > { %v1313_v55 = vpop.f32.mrf.mxu3 }
 0x3a6   : > { %v1316_v56 = vpop.f32.mrf.mxu3 }
 0x3ae   : > { %v1319_v52 = vpop.f32.mrf.mxu3 }
 0x3b6   : > { %v1322_v58 = vpop.f32.mrf.mxu3 }
 0x3be   : > { %v1325_v46 = vpop.f32.mrf.mxu3 }
 0x3c6   : > { %v1328_v62 = vpop.f32.mrf.mxu3 }
 0x3ce   : > { %v1331_v40 = vpop.f32.mrf.mxu3 }
 0x3d6   : > { %v1334_v0 = vpop.f32.mrf.mxu3 }
 0x3d7   : > { %v2511_v16 = vsub.f32 %v2311_v1, %v1334_v0  ;;  %v2526_v1 = vsub.f32 %v2278_v32, %v1325_v46  ;;  %v2541_v32 = vsub.f32 %v2272_v17, %v1316_v56  ;;  %v2556_v17 = vsub.f32 %v2266_v4, %v1307_v26 }
 0x3d9   : > { %v1376_v18 = vmul.f32 %v2511_v16, %v2511_v16  ;;  %v1373_v27 = vmul.f32 %v2526_v1, %v2526_v1  ;;  %v1370_v30 = vmul.f32 %v2541_v32, %v2541_v32 }
 0x3de   : > { %v1337_v33 = vpop.f32.mrf.mxu3 }
 0x3df   : > { %v2506_v13 = vsub.f32 %v2304_v63, %v1337_v33  ;;  %v2521_v63 = vsub.f32 %v2323_v53, %v1328_v62  ;;  %v2536_v53 = vsub.f32 %v2274_v25, %v1319_v52  ;;  %v2551_v25 = vsub.f32 %v2268_v11, %v1310_v54 }
 0x3e0   : > { %v1349_v11 = vsub.f32 %v2262_v59, %v1301_v51  ;;  %v1367_v54 = vmul.f32 %v2556_v17, %v2556_v17 }
 0x3e1   : > { %v1374_v20 = vmul.f32 %v2521_v63, %v2521_v63  ;;  %v1371_v28 = vmul.f32 %v2536_v53, %v2536_v53 }
 0x3e2   : > { %v1365_v4 = vmul.f32 %v1349_v11, %v1349_v11 }
 0x3e6   : > { %v1340_v3 = vpop.f32.mrf.mxu3 }
 0x3e7   : > { %v2501_v6 = vsub.f32 %v2297_v60, %v1340_v3  ;;  %v1377_v60 = vmul.f32 %v2506_v13, %v2506_v13 }
 0x3ee   : > { %v1343_v8 = vpop.f32.mrf.mxu3 }
 0x3ef   : > { %v2495_v9 = vsub.f32 %v2290_v57, %v1343_v8  ;;  %v2516_v57 = vsub.f32 %v2317_v2, %v1331_v40  ;;  %v2531_v2 = vsub.f32 %v2276_v29, %v1322_v58  ;;  %v2546_v29 = vsub.f32 %v2270_v14, %v1313_v55 }
 0x3f0   : > { %v1350_v14 = vsub.f32 %v2264_v61, %v1304_v22  ;;  %v1368_v55 = vmul.f32 %v2551_v25, %v2551_v25 }
 0x3f1   : > { %v1379_v7 = vmul.f32 %v2495_v9, %v2495_v9  ;;  %v1375_v19 = vmul.f32 %v2516_v57, %v2516_v57  ;;  %v1372_v5 = vmul.f32 %v2531_v2, %v2531_v2  ;;  %v1369_v23 = vmul.f32 %v2546_v29, %v2546_v29 }
 0x3f2   : > { %v1366_v56 = vmul.f32 %v1350_v14, %v1350_v14 }
 0x3f6   : > { %v1346_v39 = vpop.f32.mrf.mxu3 }
 0x3f7   : > { %v2498_v10 = vsub.f32 %v2281_v38, %v1346_v39  ;;  %v1378_v38 = vmul.f32 %v2501_v6, %v2501_v6 }
 0x3f9   : > { %v1380_v12 = vmul.f32 %v2498_v10, %v2498_v10 }
 0x3fb   : > { %1381 = vmatpush.msrb.mxu0 %v1380_v12 }
 0x3fd   : > { %1382 = vmatpush.msrb.mxu0 %v1379_v7 }
 0x3ff   : > { %1383 = vmatpush.msrb.mxu0 %v1378_v38 }
 0x401   : > { %1384 = vmatpush.msrb.mxu0 %v1377_v60 }
 0x403   : > { %1385 = vmatpush.msrb.mxu0 %v1376_v18 }
 0x405   : > { %1386 = vmatpush.msrb.mxu0 %v1375_v19 }
 0x407   : > { %1387 = vmatpush.msrb.mxu0 %v1374_v20 }
 0x409   : > { %1388 = vmatpush.msrb.mxu0 %v1373_v27 }
 0x40b   : > { %1389 = vmatpush.msrb.mxu0 %v1372_v5 }
 0x40d   : > { %1390 = vmatpush.msrb.mxu0 %v1371_v28 }
 0x40f   : > { %1391 = vmatpush.msrb.mxu0 %v1370_v30 }
 0x411   : > { %1392 = vmatpush.msrb.mxu0 %v1369_v23 }
 0x413   : > { %1393 = vmatpush.msrb.mxu0 %v1368_v55 }
 0x415   : > { %1394 = vmatpush.msrb.mxu0 %v1367_v54 }
 0x417   : > { %1395 = vmatpush.msrb.mxu0 %v1366_v56 }
 0x419   : > { %1396 = vmatpush.msrb.mxu0 %v1365_v4 }
 0x41a   : > { %1397 = vmatmul.f32.vlgmr.msrb.gmra.mxu0 %v2362_v15  ;;  %v2603_v15 = vld [vmem:[%s2713_s2] ss:$0 sm:$0xff] }
 0x497   : > { %v1398_v26 = vpop.f32.mrf.mxu0 }
 0x498   : > { %1417 = vmatmul.f32.vlgmr.msra.gmra.mxu1 %v1398_v26 }
 0x515   : > { %v1418_v61 = vpop.f32.mrf.mxu1 }
 0x516   : > { %v1421_v22 = vmul.f32 0.015625, %v1418_v61 }
 0x518   : > { %v1422_v52 = vadd.f32 1e-05, %v1421_v22 }
 0x51a   : > { %1889 = vrsqrt.f32 %v1422_v52  ;;  %vm1429_vm6 = vweird.f32 %v1422_v52 }
 0x520   : > { %v1890_v58 = vpop.eup %1889 }
 0x521   : > { %v1424_v46 = vmul.f32 %v1890_v58, %v1422_v52  ;;  %vm1430_vm5 = vweird.f32 %v1890_v58 }
 0x522   : > { %vm1431_vm7 = vmor %vm1429_vm6, %vm1430_vm5 }
 0x523   : > { %v1425_v59 = vmul.f32 %v1890_v58, %v1424_v46 }
 0x525   : > { %v1426_v51 = vmul.f32 0.5, %v1425_v59 }
 0x527   : > { %v1427_v62 = vsub.f32 1.5, %v1426_v51 }
 0x529   : > { %v1428_v40 = vmul.f32 %v1890_v58, %v1427_v62 }
 0x52b   : > { %v1432_v0 = vsel %vm1431_vm7, %v1890_v58, %v1428_v40 }
 0x52c   : > { %1799 = vmatmul.msk.f32.vlgmr.msrb.gmra.mxu2 %vm1211_vm0, %v1432_v0 }
 0x5af   : > { %v1453_v33 = vpop.f32.mrf.mxu2 }
 0x5b0   : > { %1471 = vmatpush.msra.mxu0 %v1453_v33 }
 0x5b1   : > { %1800 = vmatmul.msk.f32.vlgmr.msra.gmra.mxu0 %vm1235_vm3, %v2385_v31 }
 0x5b9   : > { %1801 = vmatmul.msk.f32.gmra.mxu0 %vm1235_vm3, %v2392_v24 }
 0x5c1   : > { %1802 = vmatmul.msk.f32.gmra.mxu0 %vm1235_vm3, %v2399_v21  ;;  %v2609_v21 = vld [vmem:[%s2714_s3] ss:$0 sm:$0xff] }
 0x5c9   : > { %1803 = vmatmul.msk.f32.gmra.mxu0 %vm1235_vm3, %v2406_v34 }
 0x5d1   : > { %1804 = vmatmul.msk.f32.gmra.mxu0 %vm1235_vm3, %v2413_v35 }
 0x5d9   : > { %1805 = vmatmul.msk.f32.gmra.mxu0 %vm1235_vm3, %v2420_v36 }
 0x5e1   : > { %1806 = vmatmul.msk.f32.gmra.mxu0 %vm1235_vm3, %v2427_v37 }
 0x5e9   : > { %1807 = vmatmul.msk.f32.gmra.mxu0 %vm1235_vm3, %v2434_v41 }
 0x5f1   : > { %1808 = vmatmul.msk.f32.gmra.mxu0 %vm1235_vm3, %v2441_v42 }
 0x5f9   : > { %1809 = vmatmul.msk.f32.gmra.mxu0 %vm1235_vm3, %v2448_v43 }
 0x601   : > { %1810 = vmatmul.msk.f32.gmra.mxu0 %vm1235_vm3, %v2455_v44 }
 0x609   : > { %1811 = vmatmul.msk.f32.gmra.mxu0 %vm1235_vm3, %v2462_v45 }
 0x611   : > { %1812 = vmatmul.msk.f32.gmra.mxu0 %vm1235_vm3, %v2469_v47 }
 0x619   : > { %1813 = vmatmul.msk.f32.gmra.mxu0 %vm1235_vm3, %v2476_v48 }
 0x621   : > { %1814 = vmatmul.msk.f32.gmra.mxu0 %vm1235_vm3, %v2483_v49 }
 0x629   : > { %1815 = vmatmul.msk.f32.gmra.mxu0 %vm1235_vm3, %v2490_v50 }
 0x62e   : > { %v1473_v31 = vpop.f32.mrf.mxu0 }
 0x62f   : > { %v1521_v24 = vmul.f32 %v1473_v31, %v1349_v11 }
 0x631   : > { %v1541_v34 = vmul.f32 %v2603_v15, %v1521_v24 }
 0x633   : > { %v1561_v35 = vadd.f32 %v2609_v21, %v1541_v34 }
 0x635   : > { %v1577_v36 = vmax.f32 %v1561_v35, 0.0 }
 0x636   : > { %v1476_v37 = vpop.f32.mrf.mxu0 }
 0x637   : > { %1593 = vst [vmem:[%s2615_s22] sm:$0xff] %v1577_v36  ;;  %v1522_v41 = vmul.f32 %v1476_v37, %v1350_v14 }
 0x639   : > { %v1542_v42 = vmul.f32 %v2603_v15, %v1522_v41 }
 0x63b   : > { %v1562_v43 = vadd.f32 %v2609_v21, %v1542_v42 }
 0x63d   : > { %v1578_v44 = vmax.f32 %v1562_v43, 0.0 }
 0x63e   : > { %v1479_v45 = vpop.f32.mrf.mxu0 }
 0x63f   : > { %1594 = vst [vmem:[%s2615_s22 + $0x8] sm:$0xff] %v1578_v44  ;;  %v1523_v47 = vmul.f32 %v1479_v45, %v2556_v17 }
 0x641   : > { %v1543_v48 = vmul.f32 %v2603_v15, %v1523_v47 }
 0x643   : > { %v1563_v49 = vadd.f32 %v2609_v21, %v1543_v48 }
 0x645   : > { %v1579_v50 = vmax.f32 %v1563_v49, 0.0 }
 0x646   : > { %v1482_v3 = vpop.f32.mrf.mxu0 }
 0x647   : > { %1595 = vst [vmem:[%s2615_s22 + $0x10] sm:$0xff] %v1579_v50  ;;  %v1524_v8 = vmul.f32 %v1482_v3, %v2551_v25 }
 0x649   : > { %v1544_v39 = vmul.f32 %v2603_v15, %v1524_v8 }
 0x64b   : > { %v1564_v12 = vadd.f32 %v2609_v21, %v1544_v39 }
 0x64d   : > { %v1580_v7 = vmax.f32 %v1564_v12, 0.0 }
 0x64e   : > { %v1485_v38 = vpop.f32.mrf.mxu0 }
 0x64f   : > { %1596 = vst [vmem:[%s2615_s22 + $0x18] sm:$0xff] %v1580_v7  ;;  %v1525_v60 = vmul.f32 %v1485_v38, %v2546_v29 }
 0x651   : > { %v1545_v18 = vmul.f32 %v2603_v15, %v1525_v60 }
 0x653   : > { %v1565_v19 = vadd.f32 %v2609_v21, %v1545_v18 }
 0x655   : > { %v1581_v20 = vmax.f32 %v1565_v19, 0.0 }
 0x656   : > { %v1488_v27 = vpop.f32.mrf.mxu0 }
 0x657   : > { %1597 = vst [vmem:[%s2615_s22 + $0x20] sm:$0xff] %v1581_v20  ;;  %v1526_v5 = vmul.f32 %v1488_v27, %v2541_v32 }
 0x659   : > { %v1546_v28 = vmul.f32 %v2603_v15, %v1526_v5 }
 0x65b   : > { %v1566_v25 = vadd.f32 %v2609_v21, %v1546_v28 }
 0x65d   : > { %v1582_v30 = vmax.f32 %v1566_v25, 0.0 }
 0x65e   : > { %v1491_v17 = vpop.f32.mrf.mxu0 }
 0x65f   : > { %1598 = vst [vmem:[%s2615_s22 + $0x28] sm:$0xff] %v1582_v30  ;;  %v1527_v29 = vmul.f32 %v1491_v17, %v2536_v53 }
 0x661   : > { %v1547_v23 = vmul.f32 %v2603_v15, %v1527_v29 }
 0x663   : > { %v1567_v14 = vadd.f32 %v2609_v21, %v1547_v23 }
 0x665   : > { %v1583_v55 = vmax.f32 %v1567_v14, 0.0 }
 0x666   : > { %v1494_v11 = vpop.f32.mrf.mxu0 }
 0x667   : > { %1599 = vst [vmem:[%s2615_s22 + $0x30] sm:$0xff] %v1583_v55  ;;  %v1528_v32 = vmul.f32 %v1494_v11, %v2531_v2 }
 0x669   : > { %v1548_v54 = vmul.f32 %v2603_v15, %v1528_v32 }
 0x66b   : > { %v1568_v56 = vadd.f32 %v2609_v21, %v1548_v54 }
 0x66d   : > { %v1584_v4 = vmax.f32 %v1568_v56, 0.0 }
 0x66e   : > { %v1497_v26 = vpop.f32.mrf.mxu0 }
 0x66f   : > { %1600 = vst [vmem:[%s2615_s22 + $0x38] sm:$0xff] %v1584_v4  ;;  %v1529_v53 = vmul.f32 %v1497_v26, %v2526_v1 }
 0x671   : > { %v1549_v61 = vmul.f32 %v2603_v15, %v1529_v53 }
 0x673   : > { %v1569_v22 = vadd.f32 %v2609_v21, %v1549_v61 }
 0x675   : > { %v1585_v52 = vmax.f32 %v1569_v22, 0.0 }
 0x676   : > { %v1500_v58 = vpop.f32.mrf.mxu0 }
 0x677   : > { %1601 = vst [vmem:[%s2615_s22 + $0x40] sm:$0xff] %v1585_v52  ;;  %v1530_v2 = vmul.f32 %v1500_v58, %v2521_v63 }
 0x679   : > { %v1550_v46 = vmul.f32 %v2603_v15, %v1530_v2 }
 0x67b   : > { %v1570_v59 = vadd.f32 %v2609_v21, %v1550_v46 }
 0x67d   : > { %v1586_v51 = vmax.f32 %v1570_v59, 0.0 }
 0x67e   : > { %v1503_v62 = vpop.f32.mrf.mxu0 }
 0x67f   : > { %1602 = vst [vmem:[%s2615_s22 + $0x48] sm:$0xff] %v1586_v51  ;;  %v1531_v1 = vmul.f32 %v1503_v62, %v2516_v57 }
 0x681   : > { %v1551_v40 = vmul.f32 %v2603_v15, %v1531_v1 }
 0x683   : > { %v1571_v0 = vadd.f32 %v2609_v21, %v1551_v40 }
 0x685   : > { %v1587_v33 = vmax.f32 %v1571_v0, 0.0 }
 0x686   : > { %v1506_v31 = vpop.f32.mrf.mxu0 }
 0x687   : > { %1603 = vst [vmem:[%s2615_s22 + $0x50] sm:$0xff] %v1587_v33  ;;  %v1532_v63 = vmul.f32 %v1506_v31, %v2511_v16 }
 0x689   : > { %v1552_v24 = vmul.f32 %v2603_v15, %v1532_v63 }
 0x68b   : > { %v1572_v34 = vadd.f32 %v2609_v21, %v1552_v24 }
 0x68d   : > { %v1588_v35 = vmax.f32 %v1572_v34, 0.0 }
 0x68e   : > { %v1509_v36 = vpop.f32.mrf.mxu0 }
 0x68f   : > { %1604 = vst [vmem:[%s2615_s22 + $0x58] sm:$0xff] %v1588_v35  ;;  %v1533_v57 = vmul.f32 %v1509_v36, %v2506_v13 }
 0x691   : > { %v1553_v37 = vmul.f32 %v2603_v15, %v1533_v57 }
 0x693   : > { %v1573_v41 = vadd.f32 %v2609_v21, %v1553_v37 }
 0x695   : > { %v1589_v42 = vmax.f32 %v1573_v41, 0.0 }
 0x696   : > { %v1512_v43 = vpop.f32.mrf.mxu0 }
 0x697   : > { %1605 = vst [vmem:[%s2615_s22 + $0x60] sm:$0xff] %v1589_v42  ;;  %v1534_v16 = vmul.f32 %v1512_v43, %v2501_v6 }
 0x699   : > { %v1554_v44 = vmul.f32 %v2603_v15, %v1534_v16 }
 0x69b   : > { %v1574_v45 = vadd.f32 %v2609_v21, %v1554_v44 }
 0x69d   : > { %v1590_v47 = vmax.f32 %v1574_v45, 0.0 }
 0x69e   : > { %v1515_v48 = vpop.f32.mrf.mxu0 }
 0x69f   : > { %1606 = vst [vmem:[%s2615_s22 + $0x68] sm:$0xff] %v1590_v47  ;;  %v1535_v13 = vmul.f32 %v1515_v48, %v2495_v9 }
 0x6a1   : > { %v1555_v49 = vmul.f32 %v2603_v15, %v1535_v13 }
 0x6a3   : > { %v1575_v50 = vadd.f32 %v2609_v21, %v1555_v49 }
 0x6a5   : > { %v1591_v3 = vmax.f32 %v1575_v50, 0.0 }
 0x6a6   : > { %v1518_v8 = vpop.f32.mrf.mxu0 }
 0x6a7   : > { %1607 = vst [vmem:[%s2615_s22 + $0x70] sm:$0xff] %v1591_v3  ;;  %v1536_v6 = vmul.f32 %v1518_v8, %v2498_v10 }
 0x6a9   : > { %v1556_v39 = vmul.f32 %v2603_v15, %v1536_v6 }
 0x6ab   : > { %v1576_v9 = vadd.f32 %v2609_v21, %v1556_v39 }
 0x6ad   : > { %v1592_v12 = vmax.f32 %v1576_v9, 0.0 }
 0x6af   : > { %1608 = vst [vmem:[%s2615_s22 + $0x78] sm:$0xff] %v1592_v12 }
 0x6b0   : > { %1918 = shalt.err (!%p1915_p3)
}
 0x6b1   : > { %s1955_s19 = smov 128   ;;  %s1956_s22 = smov 8  }
 0x6b2   : > { %1846 = dma.vmem_to_hbm [thread:$0]  (%p2040_p5), %s1623_s12, 2048, %s1625_s13, %s1610_s9, %s1955_s19, %s1955_s19, %s1956_s22  }
 0x6b3 PF: > { %p1852_p4 = scmp.ge.s32.totalorder %s1953_s30, 2  ;;  %s1639_s25 = sand.u32 1, %s1941_s27  }
 0x6b4   : > { %s1640_s26 = scalar_lea.sflag [#allocation3], %s1639_s25 }
 0x6b5   : > { %p1849_p7 = pnand %p1852_p4, %p2044_p6 }
 0x6b7   : > { %p1850_p8 = pneg %p1849_p7 }
 0x6b9   : > { %1936 = dma.done.wait (%p1850_p8), %s1640_s26, 2048  }
 0x6ba   : > { %1938 = vsyncadd (%p1850_p8), %s1640_s26, 4294965248  ;;  %p18_p9 = scmp.ge.s32.totalorder %s2027_s11, 4   ;;  %s2722_s27 = smov %s1945_s28 }
 0x6bb   : > { %s2723_s28 = smov %s1949_s29  ;;  %s2724_s29 = smov %s2038_s14 }
 0x6bc   : > { %s2725_s30 = smov %s2027_s11  ;;  %20 = sbr.rel (!%p18_p9) target bundleno = 3 (0x3), region = 89 }
 0x6c1   :  { %1646 = vsyncpa [#allocation3], 1 }
 0x6c2   :  { %1648 = vsyncpa [#allocation3 + $0x1], 1 }

</bundles_post_ra>
